<compile_context>
chip_gen: v5e
topology: v5e:2x2
jax: 0.10.0
libtpu: 0.0.40
codegen_flags: <defaults>
</compile_context>

<pallas_src>
import functools

import jax
import jax.numpy as jnp
from jax.experimental import pallas as pl
from jax.experimental.pallas import tpu as pltpu

NUM_CLASSES = 7
FEAT_DIM = 1536
CLASS_PAD = 128           # lane-dense padded class dimension
NEG_BIAS = -1e9           # padded-class bias -> exp() underflows to exactly 0


def _pick_spatial_tile(hw):
    """Largest power-of-two-ish spatial tile that divides H*W and gives >=2 steps."""
    for ts in (2048, 1024, 512, 256, 128):
        if hw % ts == 0 and hw // ts >= 2:
            return ts
    for ts in (2048, 1024, 512, 256, 128):
        if hw % ts == 0:
            return ts
    # TODO(synk): H*W not a multiple of 128 (e.g. 299x299) falls back to one
    # whole-spatial block; a padded/Element-indexed tiling would be needed there.
    return hw


def classifier_kernel(img_ref, w_fused_ref, b_head_ref, out_ref, acc_ref, *, inv_hw):
    # grid = (batch blocks ["parallel"], spatial chunks ["arbitrary" reduction])
    s = pl.program_id(1)

    @pl.when(s == 0)
    def _init():
        acc_ref[...] = jnp.zeros_like(acc_ref)

    # Partial spatial sum for this chunk: bf16 DMA, f32 compute (v5e has no bf16 VPU).
    chunk = img_ref[...].astype(jnp.float32)            # (tb, C, ts)
    acc_ref[...] += jnp.sum(chunk, axis=-1)             # (tb, C)

    @pl.when(s == pl.num_programs(1) - 1)
    def _finalize():
        # Global average pool (backbone stand-in), fused projection+head matmul.
        pooled = acc_ref[...] * inv_hw                                   # (tb, C)
        logits = jnp.dot(pooled, w_fused_ref[...],
                         preferred_element_type=jnp.float32)             # (tb, 128)
        logits = logits + b_head_ref[...]          # padded lanes biased to NEG_BIAS

        # Softmax over the (padded) class lanes; padded lanes exp to exactly 0.
        m = jnp.max(logits, axis=1, keepdims=True)
        e = jnp.exp(logits - m)
        denom = jnp.sum(e, axis=1, keepdims=True)
        # EUP approximate reciprocal + one Newton-Raphson step (near-f32 accurate,
        # avoids the VALU divide).
        r = pl.reciprocal(denom, approx=True)
        r = r * (2.0 - denom * r)
        out_ref[...] = e * r


def classifier_forward(img_nchw, w_proj, w_head, b_head):
    B, C, H, W = img_nchw.shape
    HW = H * W

    # ---- wrapper-side (XLA) prep -------------------------------------------
    # Exact algebraic fusion of the stand-in path: GAP -> w_proj -> w_head has
    # no nonlinearity in between, so pooled @ (w_proj @ w_head) is identical.
    # (Not valid once the real backbone produces the 1536-d feature.)
    w_head_pad = jnp.zeros((FEAT_DIM, CLASS_PAD), jnp.float32)
    w_head_pad = w_head_pad.at[:, :NUM_CLASSES].set(w_head.astype(jnp.float32))
    w_fused = jnp.dot(w_proj.astype(jnp.float32), w_head_pad)           # (C, 128)

    b_pad = jnp.full((1, CLASS_PAD), NEG_BIAS, jnp.float32)
    b_pad = b_pad.at[:, :NUM_CLASSES].set(
        b_head.reshape(1, NUM_CLASSES).astype(jnp.float32))

    # bf16 image DMA halves HBM traffic; compute is cast back to f32 in-kernel.
    img3d = img_nchw.reshape(B, C, HW).astype(jnp.bfloat16)

    ts = _pick_spatial_tile(HW)
    tb = 8 if (B % 8 == 0) else B                 # batch block (full B when small)
    grid = (B // tb, HW // ts)

    kernel = functools.partial(classifier_kernel, inv_hw=1.0 / float(HW))

    out_pad = pl.pallas_call(
        kernel,
        out_shape=jax.ShapeDtypeStruct((B, CLASS_PAD), jnp.float32),
        grid_spec=pltpu.PrefetchScalarGridSpec(
            num_scalar_prefetch=0,
            grid=grid,
            in_specs=[
                pl.BlockSpec((tb, C, ts), lambda b, s: (b, 0, s)),      # image chunk
                pl.BlockSpec((C, CLASS_PAD), lambda b, s: (0, 0)),      # fused weight
                pl.BlockSpec((1, CLASS_PAD), lambda b, s: (0, 0)),      # padded bias
            ],
            out_specs=pl.BlockSpec((tb, CLASS_PAD), lambda b, s: (b, 0)),
            scratch_shapes=[pltpu.VMEM((tb, C), jnp.float32)],          # pool accum
        ),
        compiler_params=pltpu.CompilerParams(
            dimension_semantics=("parallel", "arbitrary"),
            vmem_limit_bytes=32 * 1024 * 1024,    # safe on v7x (64 MiB physical)
        ),
    )(img3d, w_fused, b_pad)

    return out_pad[:, :NUM_CLASSES]               # drop padded class lanes


if __name__ == "__main__":
    key = jax.random.PRNGKey(0)
    k_img, k_proj, k_w, k_b = jax.random.split(key, 4)

    # Small shapes consistent with the forward: NCHW image in, 7-way softmax out.
    B, C, H, W = 2, 4, 16, 16
    img = jax.random.normal(k_img, (B, C, H, W), jnp.float32)

    # Deterministic synthetic parameters (shapes from the module definition).
    w_proj = jax.random.normal(k_proj, (C, FEAT_DIM), jnp.float32) * 0.05
    # PyTorch nn.Linear(1536, 7): weight (7, 1536) used as x @ W.T; stored
    # pre-transposed as (1536, 7) -- identical semantics.
    bound = 1.0 / (FEAT_DIM ** 0.5)
    w_head = jax.random.uniform(k_w, (FEAT_DIM, NUM_CLASSES), jnp.float32,
                                minval=-bound, maxval=bound)
    b_head = jax.random.uniform(k_b, (1, NUM_CLASSES), jnp.float32,
                                minval=-bound, maxval=bound)

    out = classifier_forward(img, w_proj, w_head, b_head)
    out = jax.block_until_ready(out)

    assert out.shape == (B, NUM_CLASSES)
    row_sums = jnp.sum(out, axis=1)
    assert bool(jnp.all(jnp.abs(row_sums - 1.0) < 1e-4))
    assert bool(jnp.all(out >= 0.0))

    print("KERNEL_OK")
</pallas_src>

<mosaic_0001>
module attributes {stable_mosaic.version = 11 : i64} {
  func.func @classifier_kernel(%arg0: i32, %arg1: i32, %arg2: memref<2x4x128xbf16, #tpu.memory_space<vmem>>, %arg3: memref<4x128xf32, #tpu.memory_space<vmem>>, %arg4: memref<1x128xf32, #tpu.memory_space<vmem>>, %arg5: memref<2x128xf32, #tpu.memory_space<vmem>>, %arg6: memref<2x4xf32, #tpu.memory_space<vmem>>) attributes {dimension_semantics = [#tpu.dimension_semantics<parallel>, #tpu.dimension_semantics<arbitrary>], iteration_bounds = array<i64: 1, 2>, scalar_prefetch = 0 : i64, scratch_operands = 1 : i64, tpu.core_type = #tpu.core_type<tc>, window_params = [{transform_indices = @transform_0, window_bounds = array<i64: 2, 4, 128>}, {pipeline_mode = #tpu.pipeline_mode<synchronous>, transform_indices = @transform_1, window_bounds = array<i64: 4, 128>}, {pipeline_mode = #tpu.pipeline_mode<synchronous>, transform_indices = @transform_2, window_bounds = array<i64: 1, 128>}, {transform_indices = @transform_3, window_bounds = array<i64: 2, 128>}]} {
    %c0_i32 = arith.constant 0 : i32
    %0 = arith.cmpi eq, %arg1, %c0_i32 : i32
    %1 = arith.extui %0 : i1 to i32
    %c0_i32_0 = arith.constant 0 : i32
    %2 = arith.cmpi ne, %1, %c0_i32_0 : i32
    scf.if %2 {
      %cst_8 = arith.constant 0.000000e+00 : f32
      %12 = vector.broadcast %cst_8 : f32 to vector<2x4xf32>
      %c0_9 = arith.constant 0 : index
      %c0_10 = arith.constant 0 : index
      %13 = vector.load %arg6[%c0_9, %c0_10] : memref<2x4xf32, #tpu.memory_space<vmem>>, vector<2x4xf32>
      tpu.vector_store %arg6[%c0_9, %c0_10], %12 {strides = array<i32>} : memref<2x4xf32, #tpu.memory_space<vmem>>, vector<2x4xf32>,
    } else {
    }
    %c0 = arith.constant 0 : index
    %c0_1 = arith.constant 0 : index
    %c0_2 = arith.constant 0 : index
    %3 = vector.load %arg2[%c0, %c0_1, %c0_2] : memref<2x4x128xbf16, #tpu.memory_space<vmem>>, vector<2x4x128xbf16>
    %4 = arith.extf %3 : vector<2x4x128xbf16> to vector<2x4x128xf32>
    %c0_3 = arith.constant 0 : index
    %c0_4 = arith.constant 0 : index
    %5 = vector.load %arg6[%c0_3, %c0_4] : memref<2x4xf32, #tpu.memory_space<vmem>>, vector<2x4xf32>
    %cst = arith.constant dense<0.000000e+00> : vector<2x4xf32>
    %6 = vector.multi_reduction <add>, %4, %cst [2] : vector<2x4x128xf32> to vector<2x4xf32>
    %7 = arith.addf %5, %6 : vector<2x4xf32>
    %c0_5 = arith.constant 0 : index
    %c0_6 = arith.constant 0 : index
    %8 = vector.load %arg6[%c0_5, %c0_6] : memref<2x4xf32, #tpu.memory_space<vmem>>, vector<2x4xf32>
    tpu.vector_store %arg6[%c0_5, %c0_6], %7 {strides = array<i32>} : memref<2x4xf32, #tpu.memory_space<vmem>>, vector<2x4xf32>,
    %c1_i32 = arith.constant 1 : i32
    %9 = arith.cmpi eq, %arg1, %c1_i32 : i32
    %10 = arith.extui %9 : i1 to i32
    %c0_i32_7 = arith.constant 0 : i32
    %11 = arith.cmpi ne, %10, %c0_i32_7 : i32
    scf.if %11 {
      %c0_8 = arith.constant 0 : index
      %c0_9 = arith.constant 0 : index
      %12 = vector.load %arg6[%c0_8, %c0_9] : memref<2x4xf32, #tpu.memory_space<vmem>>, vector<2x4xf32>
      %cst_10 = arith.constant 3.906250e-03 : f32
      %13 = vector.broadcast %cst_10 : f32 to vector<2x4xf32>
      %14 = arith.mulf %12, %13 : vector<2x4xf32>
      %c0_11 = arith.constant 0 : index
      %c0_12 = arith.constant 0 : index
      %15 = vector.load %arg3[%c0_11, %c0_12] : memref<4x128xf32, #tpu.memory_space<vmem>>, vector<4x128xf32>
      %cst_13 = arith.constant dense<0.000000e+00> : vector<2x128xf32>
      %16 = tpu.matmul %14, %15, %cst_13 {dimension_numbers = #tpu.dot_dimension_numbers<[1], [0], [0], [1], [0, 0, 1, 1], [], []>} : vector<2x4xf32>, vector<4x128xf32>, vector<2x128xf32> -> vector<2x128xf32>
      %c0_14 = arith.constant 0 : index
      %c0_15 = arith.constant 0 : index
      %17 = vector.load %arg4[%c0_14, %c0_15] : memref<1x128xf32, #tpu.memory_space<vmem>>, vector<1x128xf32>
      %18 = vector.broadcast %17 : vector<1x128xf32> to vector<2x128xf32>
      %19 = arith.addf %16, %18 : vector<2x128xf32>
      %cst_16 = arith.constant dense<0xFF800000> : vector<2xf32>
      %20 = vector.multi_reduction <maximumf>, %19, %cst_16 [1] : vector<2x128xf32> to vector<2xf32>
      %21 = vector.shape_cast %20 : vector<2xf32> to vector<2x1xf32>
      %22 = vector.broadcast %21 : vector<2x1xf32> to vector<2x128xf32>
      %23 = arith.subf %19, %22 : vector<2x128xf32>
      %24 = math.exp %23 : vector<2x128xf32>
      %cst_17 = arith.constant dense<0.000000e+00> : vector<2xf32>
      %25 = vector.multi_reduction <add>, %24, %cst_17 [1] : vector<2x128xf32> to vector<2xf32>
      %26 = vector.shape_cast %25 : vector<2xf32> to vector<2x1xf32>
      %27 = tpu.reciprocal %26 {approx = true} : vector<2x1xf32> -> vector<2x1xf32>
      %28 = arith.mulf %26, %27 : vector<2x1xf32>
      %cst_18 = arith.constant 2.000000e+00 : f32
      %29 = vector.broadcast %cst_18 : f32 to vector<2x1xf32>
      %30 = arith.subf %29, %28 : vector<2x1xf32>
      %31 = arith.mulf %27, %30 : vector<2x1xf32>
      %32 = vector.broadcast %31 : vector<2x1xf32> to vector<2x128xf32>
      %33 = arith.mulf %24, %32 : vector<2x128xf32>
      %c0_19 = arith.constant 0 : index
      %c0_20 = arith.constant 0 : index
      %34 = vector.load %arg5[%c0_19, %c0_20] : memref<2x128xf32, #tpu.memory_space<vmem>>, vector<2x128xf32>
      tpu.vector_store %arg5[%c0_19, %c0_20], %33 {strides = array<i32>} : memref<2x128xf32, #tpu.memory_space<vmem>>, vector<2x128xf32>,
    } else {
    }
    return
  }
  func.func @transform_0(%arg0: i32, %arg1: i32) -> (i32, i32, i32) {
    %c0_i32 = arith.constant 0 : i32
    %c0_i32_0 = arith.constant 0 : i32
    return %arg0, %c0_i32, %arg1 : i32, i32, i32
  }
  func.func @transform_1(%arg0: i32, %arg1: i32) -> (i32, i32) {
    %c0_i32 = arith.constant 0 : i32
    %c0_i32_0 = arith.constant 0 : i32
    %c0_i32_1 = arith.constant 0 : i32
    return %c0_i32, %c0_i32_0 : i32, i32
  }
  func.func @transform_2(%arg0: i32, %arg1: i32) -> (i32, i32) {
    %c0_i32 = arith.constant 0 : i32
    %c0_i32_0 = arith.constant 0 : i32
    %c0_i32_1 = arith.constant 0 : i32
    return %c0_i32, %c0_i32_0 : i32, i32
  }
  func.func @transform_3(%arg0: i32, %arg1: i32) -> (i32, i32) {
    %c0_i32 = arith.constant 0 : i32
    %c0_i32_0 = arith.constant 0 : i32
    return %arg0, %c0_i32 : i32, i32
  }
}

</mosaic_0001>

<bundles_post_ra>
// kernel: tpu_custom_call.1
= control target key start
LH: loop header
LB: loop body
LE: loop exit
PB: predicated region body
PF: predicated region fallthrough
CT: control target
= control target key end

     0   :  { %8 = vsyncpa [#allocation4], 0  ;;  %s786_s0 = inlined_call_operand.hbm [shape: bf16[2,4,256], index: 0, kind: input, shape index: {}]   ;;  %s787_s1 = inlined_call_operand.hbm [shape: f32[4,128], index: 1, kind: input, shape index: {}]   ;;  %s788_s2 = inlined_call_operand.vmem [shape: f32[1,128], index: 2, kind: input, shape index: {}]   ;;  %s789_s3 = inlined_call_operand.hbm [shape: f32[2,128], index: 3, kind: output, shape index: {}]  }
   0x1   :  { %10 = vsyncpa [#allocation4 + $0x1], 0 }
   0x2   :  { %11 = vsyncpa [#allocation7], 0 }
   0x3   :  { %12 = vsyncpa [#allocation5], 0  ;;  %s657_s12 = smov 0   ;;  %s659_s13 = smov 0  }
   0x4   :  { %s661_s14 = smov 0   ;;  %s663_s15 = smov 0  }
   0x5   :  { %s665_s16 = smov 0   ;;  %s667_s17 = smov 0  }
   0x6 LB: > { %s384_s18 = sadd.s32 4294967295, %s629_s17   ;;  %s39_s19 = sadd.s32 1, %s617_s14  ;;  %s629_s17 = sphi %s667_s17, %s18_s17   ;;  %s625_s16 = sphi %s665_s16, %s799_s16   ;;  %s621_s15 = sphi %s663_s15, %s798_s15   ;;  %s617_s14 = sphi %s661_s14, %s797_s14   ;;  %s613_s13 = sphi %s659_s13, %s796_s13   ;;  %s609_s12 = sphi %s657_s12, %s795_s12  }
   0x7   : > { %p46_p0 = scmp.ne.s32.totalorder %s617_s14, %s613_s13  ;;  %p47_p1 = scmp.eq.s32.totalorder %s629_s17, 0 }
   0x8   : > { %p52_p2 = scmp.ne.s32.totalorder %s613_s13, %s609_s12  ;;  %p693_p3 = scmp.eq.s32.totalorder %s384_s18, 0 }
   0x9   : > { %p697_p4 = por %p47_p1, %p46_p0  ;;  %p385_p5 = scmp.ge.s32.totalorder %s629_s17, 1 }
   0xa   : > { %p704_p6 = por %p693_p3, %p52_p2  ;;  %p131_p7 = scmp.lt.s32.totalorder %s629_s17, 3 }
   0xb   : > { %s143_s25 = sshll.u32 %s787_s1, 4  ;;  %s631_s27 = smov [#allocation6]   ;;  %s144_s25 = int_to_ptr.hbm [resolvable:$true] %s143_s25 }
   0xc   : > { %p712_p8 = pnand %p385_p5, %p131_p7  ;;  %s145_s28 = sshll.u32 %s631_s27, 4  ;;  %s146_s28 = int_to_ptr.vmem [resolvable:$true] %s145_s28 }
   0xd   : > { %p420_p10 = scmp.lt.s32.totalorder %s629_s17, 2  ;;  %s27_s30 = sadd.s32 1, %s625_s16 }
   0xe   : > { %p411_p9 = pneg %p712_p8  ;;  %p28_p13 = scmp.ge.s32.totalorder %s27_s30, 2 }
   0xf   : > { %p723_p12 = pnand %p420_p10, %p697_p4  ;;  %s159_s4 = sand.u32 1, %s617_s14  }
  0x10   : > { %p412_p11 = pnand %p411_p9, %p693_p3  ;;  %s389_s5 = sshll.u32 %s625_s16, 1 }
  0x11   : > { %s801_s30 = smov (%p28_p13, %s27_s30), 0  ;;  %s388_s6 = sshll.u32 %s159_s4, 2 }
  0x12   : > { %414 = dma.hbm_to_vmem [thread:$0]  (!%p412_p11), %s144_s25, 64, %s146_s28, [#allocation7]  }
  0x13   : > { %s35_s7 = ssub.s32 %s625_s16, %s801_s30  ;;  %s170_s10 = scalar_lea.hbm %s786_s0, %s389_s5 }
  0x14   : > { %p37_p0 = scmp.eq.s32.totalorder %s35_s7, 0  ;;  %s171_s11 = sshll.u32 %s170_s10, 4  ;;  %s172_s11 = int_to_ptr.hbm [resolvable:$true] %s171_s11 }
  0x15   : > { %s163_s12 = scalar_lea.vmem [#allocation3], %s388_s6  ;;  %s160_s24 = scalar_lea.sflag [#allocation4], %s159_s4 }
  0x16   : > { %s173_s21 = sshll.u32 %s163_s12, 4  ;;  %s632_s25 = smov 64   ;;  %s174_s21 = int_to_ptr.vmem [resolvable:$true] %s173_s21 }
  0x17   : > { %s740_s23 = scalar_select %p37_p0, %s617_s14, %s39_s19  }
  0x18   : > { %s633_s27 = smov 32   ;;  %s634_s28 = smov 2  }
  0x19   : > { %418 = dma.hbm_to_vmem [thread:$0]  (!%p723_p12), %s172_s11, 64, %s174_s21, %s160_s24, %s632_s25, %s633_s27, %s634_s28  }
  0x1a   : > { %185 = sbr.rel (%p712_p8) target bundleno = 581 (0x245), region = 32  ;;  %s187_s5 = sand.u32 (!%p712_p8), 1, %s613_s13  }
  0x1b   : > { %s391_s7 = sshll.u32 (!%p712_p8), %s187_s5, 2  ;;  %s188_s6 = scalar_lea.sflag (!%p712_p8), [#allocation4], %s187_s5 }
  0x1c   : > { %s191_s8 = scalar_lea.vmem (!%p712_p8), [#allocation3], %s391_s7 }
  0x1f   : > { %596 = dma.done.wait (%p704_p6), %s188_s6, 64  }
  0x20   : > { %598 = vsyncadd (%p704_p6), %s188_s6, 4294967232 }
  0x21   : > { %600 = dma.done.wait (%p693_p3), [#allocation7], 64  }
  0x22   : > { %602 = vsyncadd (%p693_p3), [#allocation7], 4294967232  ;;  %p393_p1 = scmp.ne.s32.totalorder %s621_s15, 0 }
  0x24   : > { %219 = sbr.rel (%p393_p1) target bundleno = 43 (0x2b), region = 44 }
  0x29   : > { %vm220_vm0 = vcmask 25600   ;;  %v635_v0 = vmov 0.0  }
  0x2a   : > { %221 = vst.msk [vmem:[#allocation2] sm:$0x3] %vm220_vm0, %v635_v0 }
  0x2b PF: > { %v222_v1 = vld [vmem:[%s191_s8] sm:$0x3]  ;;  %vm227_vm1 = vcmask 1043456   ;;  %v223_v3 = vld [vmem:[%s191_s8 + $0x2] sm:$0x3]  ;;  %v236_v8 = vlaneseq  ;;  %vm240_vm2 = vcmask 1041409  }
  0x2c   : > { %v224_v2 = vunpack.c.l.bf16 %v222_v1  ;;  %v225_v5 = vunpack.c.l.bf16 %v223_v3  ;;  %vm244_vm3 = vcmask 25600   ;;  %p394_p2 = scmp.ne.s32.totalorder %s621_s15, 1 }
  0x2d   : > { %v237_v9 = vand.u32 127, %v236_v8 }
  0x2e   : > { %v228_v4 = vsel %vm227_vm1, %v224_v2, 0.0  ;;  %v231_v6 = vsel %vm227_vm1, %v225_v5, 0.0 }
  0x2f   : > { %229 = vadd.xlane.f32.xlu0 %v228_v4 }
  0x31   : > { %v226_v12 = vld [vmem:[#allocation2] sm:$0x3] }
  0x37   : > { %232 = vadd.xlane.f32.xlu0 %v231_v6 }
  0xa2   : > { %v230_v7 = vpop.xlane.xlu0 %229 }
  0xa3   : > { %v238_v11 = vperm.slane %v230_v7, %v237_v9 }
  0xaa   : > { %v233_v10 = vpop.xlane.xlu0 %232 }
  0xab   : > { %v239_v13 = vperm.slane %v233_v10, %v237_v9 }
  0xac   : > { %249 = sbr.rel (%p394_p2) target bundleno = 575 (0x23f), region = 48 }
  0xad   : > { %v241_v14 = vsel %vm240_vm2, %v239_v13, %v238_v11 }
  0xae   : > { %v243_v15 = vadd.f32 %v241_v14, %v226_v12 }
  0xb0   : > { %245 = vst.msk [vmem:[#allocation2] sm:$0x3] %vm244_vm3, %v243_v15 }
  0xb1   : > { %v252_v16 = vld [vmem:[#allocation6] sm:$0xf]  ;;  %vm257_vm4 = vcmask 31744   ;;  %v478_v19 = vld [vmem:[%s788_s2] ss:$0 sm:$0xff]  ;;  %vm284_vm5 = vcmask 1041408  }
  0xb2   : > { %395 = vmatpush.msk.msra.mxu0 %vm227_vm1, %v252_v16 }
  0xb7   : > { %v250_v17 = vld [vmem:[#allocation2] sm:$0x3] }
  0xb8   : > { %v251_v18 = vmul.f32 0.00390625, %v250_v17 }
  0xba   : > { %396 = vmatmul.msk.f32.vlgmr.msra.gmra.mxu0 %vm257_vm4, %v251_v18 }
 0x137   : > { %v281_v20 = vpop.f32.mrf.mxu0 }
 0x138   : > { %v282_v21 = vadd.f32 %v478_v19, %v281_v20 }
 0x13a   : > { %v285_v22 = vsel %vm284_vm5, %v282_v21, -inf }
 0x13b   : > { %286 = vmax.xlane.f32.xlu0 %v285_v22 }
 0x1ae   : > { %v287_v23 = vpop.xlane.xlu0 %286 }
 0x1af   : > { %v288_v24 = vsub.f32 %v282_v21, %v287_v23 }
 0x1b1   : > { %v289_v25 = vmul.f32 1.442695, %v288_v24 }
 0x1b3   : > { %479 = vpow2.f32 %v289_v25 }
 0x1b9   : > { %v480_v26 = vpop.eup %479 }
 0x1ba   : > { %v291_v27 = vsel %vm284_vm5, %v480_v26, 0.0 }
 0x1bb   : > { %292 = vadd.xlane.f32.xlu0 %v291_v27 }
 0x22e   : > { %v293_v28 = vpop.xlane.xlu0 %292 }
 0x22f   : > { %481 = vrcp.f32 %v293_v28 }
 0x235   : > { %v482_v29 = vpop.eup %481 }
 0x236   : > { %v295_v30 = vmul.f32 %v482_v29, %v293_v28 }
 0x238   : > { %v296_v31 = vsub.f32 2.0, %v295_v30 }
 0x23a   : > { %v297_v32 = vmul.f32 %v482_v29, %v296_v31 }
 0x23c   : > { %v298_v33 = vmul.f32 %v480_v26, %v297_v32 }
 0x23e   : > { %299 = vst [vmem:[#allocation8] sm:$0x3] %v298_v33 }
 0x23f PF: > { %p422_p3 = scmp.eq.s32.totalorder %s384_s18, 1  ;;  %s310_s26 = sshll.u32 %s789_s3, 4  ;;  %s311_s26 = int_to_ptr.hbm [resolvable:$true] %s310_s26 }
 0x240   : > { %s636_s29 = smov [#allocation8]  }
 0x241   : > { %s308_s4 = sshll.u32 %s636_s29, 4  ;;  %s309_s4 = int_to_ptr.vmem [resolvable:$true] %s308_s4 }
 0x242   : > { %408 = dma.vmem_to_hbm [thread:$0]  (%p422_p3), %s309_s4, 32, %s311_s26, [#allocation5]  }
 0x243   : > { %604 = dma.done.wait (%p422_p3), [#allocation5], 32  }
 0x244   : > { %606 = vsyncadd (%p422_p3), [#allocation5], 4294967264 }
 0x245 PF: > { %s18_s17 = sadd.s32 1, %s629_s17   ;;  %s795_s12 = smov %s613_s13 }
 0x246   : > { %p15_p4 = scmp.ge.s32.totalorder %s18_s17, 4   ;;  %s796_s13 = smov %s617_s14 }
 0x247   : > { %s797_s14 = smov %s740_s23  ;;  %s798_s15 = smov %s625_s16 }
 0x248   : > { %s799_s16 = smov %s801_s30  ;;  %17 = sbr.rel (!%p15_p4) target bundleno = 6 (0x6), region = 82 }
 0x24d   :  { %324 = vsyncpa [#allocation4], 1 }
 0x24e   :  { %326 = vsyncpa [#allocation4 + $0x1], 1 }
 0x24f   :  { %327 = vsyncpa [#allocation7], 1 }
 0x250   :  { %328 = vsyncpa [#allocation5], 1 }
 0x251   :  { %330 = vsyncpa [#allocation5 + $0x1], 1 }

</bundles_post_ra>
